<compile_context>
chip_gen: v6e
topology: v6e:2x2x1
jax: 0.10.0
libtpu: 0.0.40
codegen_flags: <defaults>
</compile_context>

<pallas_src>
import functools

import jax
import jax.numpy as jnp
from jax.experimental import pallas as pl
from jax.experimental.pallas import tpu as pltpu


def _moe_kernel(ids_ref, x_ref, w13_ref, w2_ref, pw_ref, o_ref, acc_ref, *, tI):
    # grid = (b_tile, active_expert_slot, i_tile); slot/i_tile are reductions.
    s = pl.program_id(1)
    it = pl.program_id(2)

    @pl.when((s == 0) & (it == 0))
    def _():
        acc_ref[...] = jnp.zeros_like(acc_ref)

    x = x_ref[...]          # (tB, D)
    w13 = w13_ref[0, 0]     # (D, 2*tI)  packed gate|up weights (pre-transposed)
    w2 = w2_ref[0]          # (tI, D)    down weights (pre-transposed)
    pw = pw_ref[0]          # (tB, 1)    dense routing weight for this expert slot

    # single fused gate+up projection for this I-slab (lane-dense, f32 accumulate)
    gu = jnp.dot(x, w13, preferred_element_type=jnp.float32)   # (tB, 2*tI)
    gate = gu[:, :tI]
    up = gu[:, tI:]

    # silu_and_mul on the slab
    h = (gate * jax.nn.sigmoid(gate)) * up
    h = h.astype(w2.dtype)

    # partial down projection for this I-slab, weighted by routing weight
    partial = jnp.dot(h, w2, preferred_element_type=jnp.float32)  # (tB, D)
    acc_ref[...] += partial * pw.astype(jnp.float32)

    # finalize: write the output block once per batch tile
    @pl.when((s == pl.num_programs(1) - 1) & (it == pl.num_programs(2) - 1))
    def _():
        o_ref[...] = acc_ref[...].astype(o_ref.dtype)


def _choose_i_tile(I, D, itemsize):
    """Largest multiple-of-128 divisor of I whose double-buffered weight slabs
    (packed gate|up + w2 = 3*tI*D elems) stay under a conservative, v7x-safe
    VMEM budget."""
    if I % 128 != 0:
        return I  # must take the full dim as one block to satisfy tiling rules
    budget = 24 * 1024 * 1024
    tile = 128
    for cand in range(256, I + 1, 128):
        if I % cand == 0 and 2 * 3 * cand * D * itemsize <= budget:
            tile = cand
    return tile


@functools.partial(jax.jit, static_argnames=("topk", "i_tile"))
def static_fused_moe(hidden_states, w1, w2, score, topk, i_tile=None):
    B, D = hidden_states.shape
    E, two_I, _ = w1.shape
    I = two_I // 2
    assert w2.shape == (E, D, I)
    dtype = hidden_states.dtype

    # ---------------- routing glue (plain JAX, mirrors the PyTorch code) ----------------
    routing = jax.nn.softmax(score.astype(jnp.float32), axis=-1)
    routing_weights, selected_experts = jax.lax.top_k(routing, topk)
    routing_weights = routing_weights / routing_weights.sum(axis=-1, keepdims=True)
    routing_weights = routing_weights.astype(dtype)

    # dense (B, E) routing weights via one-hot mask-sum (no scatter)
    onehot = selected_experts[..., None] == jnp.arange(E)[None, None, :]          # (B, topk, E)
    padded = jnp.sum(routing_weights[..., None] * onehot.astype(dtype), axis=1)   # (B, E)

    # compacted active-expert list with static length A = min(E, B*topk).
    # Slots beyond the number of truly active experts point at inactive experts
    # whose routing column is all-zero, so they contribute nothing.
    A = min(E, B * topk)
    hit = jnp.any(onehot, axis=(0, 1))                                            # (E,)
    active_ids = jnp.argsort(jnp.logical_not(hit), stable=True)[:A].astype(jnp.int32)
    pw_slots = jnp.take(padded.T, active_ids, axis=0)[:, :, None]                 # (A, B, 1)

    # ---------------- tiling ----------------
    if i_tile is None:
        tI = _choose_i_tile(I, D, jnp.dtype(w1.dtype).itemsize)
    else:
        assert I % i_tile == 0 and (i_tile % 128 == 0 or i_tile == I)
        tI = i_tile
    n_it = I // tI

    tB = 128 if (B % 128 == 0) else B            # parallel batch tiles when B is large
    n_b = B // tB

    # ---------------- weight layout: pack gate|up per I-tile + pre-transpose ----------------
    # w13_packed[e, it, :, :tI]  = w1[e,      it*tI:(it+1)*tI, :].T   (gate)
    # w13_packed[e, it, :, tI:]  = w1[e, I +  it*tI:(it+1)*tI, :].T   (up)
    w1g = w1[:, :I, :].reshape(E, n_it, tI, D)
    w1u = w1[:, I:, :].reshape(E, n_it, tI, D)
    w13_packed = jnp.swapaxes(jnp.concatenate([w1g, w1u], axis=2), 2, 3)  # (E, n_it, D, 2*tI)
    w2_t = jnp.swapaxes(w2, 1, 2)                                         # (E, I, D)

    out = pl.pallas_call(
        functools.partial(_moe_kernel, tI=tI),
        out_shape=jax.ShapeDtypeStruct((B, D), dtype),
        grid_spec=pltpu.PrefetchScalarGridSpec(
            num_scalar_prefetch=1,
            grid=(n_b, A, n_it),
            in_specs=[
                # hidden_states: resident per batch tile
                pl.BlockSpec((tB, D), lambda b, s, it, ids: (b, 0)),
                # packed gate|up weight slab for the active expert ids[s], I-tile it
                pl.BlockSpec((1, 1, D, 2 * tI), lambda b, s, it, ids: (ids[s], it, 0, 0)),
                # down-projection weight slab
                pl.BlockSpec((1, tI, D), lambda b, s, it, ids: (ids[s], it, 0)),
                # dense routing weight column for this expert slot
                pl.BlockSpec((1, tB, 1), lambda b, s, it, ids: (s, b, 0)),
            ],
            out_specs=pl.BlockSpec((tB, D), lambda b, s, it, ids: (b, 0)),
            scratch_shapes=[pltpu.VMEM((tB, D), jnp.float32)],
        ),
        compiler_params=pltpu.CompilerParams(
            dimension_semantics=("parallel", "arbitrary", "arbitrary"),
            vmem_limit_bytes=48 * 1024 * 1024,   # v7x-safe, leaves double-buffer headroom
        ),
    )(active_ids, hidden_states, w13_packed, w2_t, pw_slots)
    return out


def _reference(hidden_states, w1, w2, score, topk):
    """Pure-JAX reference mirroring the PyTorch StaticFusedMOE module."""
    B, D = hidden_states.shape
    E = w1.shape[0]
    routing = jax.nn.softmax(score.astype(jnp.float32), axis=1)
    vals, idx = jax.lax.top_k(routing, topk)
    vals = vals / vals.sum(axis=-1, keepdims=True)
    vals = vals.astype(hidden_states.dtype)
    padded = jnp.zeros((B, E), dtype=hidden_states.dtype)
    padded = padded.at[jnp.arange(B)[:, None], idx].set(vals)

    out = jnp.zeros((B, D), dtype=jnp.float32)
    for e in range(E):
        g = hidden_states @ w1[e].T
        d = g.shape[-1] // 2
        h = (g[:, :d] * jax.nn.sigmoid(g[:, :d])) * g[:, d:]
        o = h @ w2[e].T
        out = out + o.astype(jnp.float32) * padded[:, e:e + 1].astype(jnp.float32)
    return out.astype(hidden_states.dtype)


if __name__ == "__main__":
    # Small shapes that still exercise multi-I-tile accumulation and
    # expert skipping (A = min(E, B*topk) = 16 of E = 32 experts).
    B, D, I, E, TOPK = 8, 128, 256, 32, 2

    key = jax.random.PRNGKey(0)
    k1, k2, k3, k4 = jax.random.split(key, 4)
    hidden_states = jax.random.normal(k1, (B, D), dtype=jnp.float32)
    w1 = jax.random.normal(k2, (E, 2 * I, D), dtype=jnp.float32) * 0.05
    w2 = jax.random.normal(k3, (E, D, I), dtype=jnp.float32) * 0.05
    score = jax.random.normal(k4, (B, E), dtype=jnp.float32)

    # f32 run with explicit I-tiling (2 I-tiles of 128)
    out = static_fused_moe(hidden_states, w1, w2, score, TOPK, i_tile=128)
    out = jax.block_until_ready(out)
    ref = _reference(hidden_states, w1, w2, score, TOPK)
    assert out.shape == (B, D)
    assert jnp.allclose(out, ref, atol=1e-3, rtol=1e-3), "f32 mismatch vs reference"

    # bf16 weight/activation streaming path (recommended for production), f32 accumulation
    out_bf16 = static_fused_moe(
        hidden_states.astype(jnp.bfloat16),
        w1.astype(jnp.bfloat16),
        w2.astype(jnp.bfloat16),
        score,
        TOPK,
    )
    out_bf16 = jax.block_until_ready(out_bf16)
    assert out_bf16.shape == (B, D)
    assert jnp.allclose(out_bf16.astype(jnp.float32), ref, atol=5e-2, rtol=5e-2), \
        "bf16 mismatch vs reference"

    print("KERNEL_OK")
</pallas_src>

<mosaic_0001>
module attributes {stable_mosaic.version = 11 : i64} {
  func.func @_moe_kernel(%arg0: i32, %arg1: i32, %arg2: i32, %arg3: memref<16xi32, #tpu.memory_space<smem>>, %arg4: memref<8x128xf32, #tpu.memory_space<vmem>>, %arg5: memref<1x1x128x256xf32, #tpu.memory_space<vmem>>, %arg6: memref<1x128x128xf32, #tpu.memory_space<vmem>>, %arg7: memref<1x8x1xf32, #tpu.memory_space<vmem>>, %arg8: memref<8x128xf32, #tpu.memory_space<vmem>>, %arg9: memref<8x128xf32, #tpu.memory_space<vmem>>) attributes {dimension_semantics = [#tpu.dimension_semantics<parallel>, #tpu.dimension_semantics<arbitrary>, #tpu.dimension_semantics<arbitrary>], iteration_bounds = array<i64: 1, 16, 2>, scalar_prefetch = 1 : i64, scratch_operands = 1 : i64, tpu.core_type = #tpu.core_type<tc>, window_params = [{transform_indices = @transform_0, window_bounds = array<i64: 8, 128>}, {transform_indices = @transform_1, window_bounds = array<i64: 1, 1, 128, 256>}, {transform_indices = @transform_2, window_bounds = array<i64: 1, 128, 128>}, {transform_indices = @transform_3, window_bounds = array<i64: 1, 8, 1>}, {transform_indices = @transform_4, window_bounds = array<i64: 8, 128>}]} {
    %c0_i32 = arith.constant 0 : i32
    %0 = arith.cmpi eq, %arg1, %c0_i32 : i32
    %c0_i32_0 = arith.constant 0 : i32
    %1 = arith.cmpi eq, %arg2, %c0_i32_0 : i32
    %2 = arith.andi %0, %1 : i1
    %3 = arith.extui %2 : i1 to i32
    %c0_i32_1 = arith.constant 0 : i32
    %4 = arith.cmpi ne, %3, %c0_i32_1 : i32
    scf.if %4 {
      %cst_20 = arith.constant 0.000000e+00 : f32
      %33 = vector.broadcast %cst_20 : f32 to vector<8x128xf32>
      %c0_21 = arith.constant 0 : index
      %c0_22 = arith.constant 0 : index
      %34 = vector.load %arg9[%c0_21, %c0_22] : memref<8x128xf32, #tpu.memory_space<vmem>>, vector<8x128xf32>
      tpu.vector_store %arg9[%c0_21, %c0_22], %33 {strides = array<i32>} : memref<8x128xf32, #tpu.memory_space<vmem>>, vector<8x128xf32>,
    } else {
    }
    %c0 = arith.constant 0 : index
    %c0_2 = arith.constant 0 : index
    %5 = vector.load %arg4[%c0, %c0_2] : memref<8x128xf32, #tpu.memory_space<vmem>>, vector<8x128xf32>
    %c0_3 = arith.constant 0 : index
    %c0_4 = arith.constant 0 : index
    %c0_5 = arith.constant 0 : index
    %c0_6 = arith.constant 0 : index
    %6 = vector.load %arg5[%c0_3, %c0_4, %c0_5, %c0_6] : memref<1x1x128x256xf32, #tpu.memory_space<vmem>>, vector<1x1x128x256xf32>
    %7 = vector.shape_cast %6 : vector<1x1x128x256xf32> to vector<128x256xf32>
    %c0_7 = arith.constant 0 : index
    %c0_8 = arith.constant 0 : index
    %c0_9 = arith.constant 0 : index
    %8 = vector.load %arg6[%c0_7, %c0_8, %c0_9] : memref<1x128x128xf32, #tpu.memory_space<vmem>>, vector<1x128x128xf32>
    %9 = vector.shape_cast %8 : vector<1x128x128xf32> to vector<128x128xf32>
    %c0_10 = arith.constant 0 : index
    %c0_11 = arith.constant 0 : index
    %c0_12 = arith.constant 0 : index
    %10 = vector.load %arg7[%c0_10, %c0_11, %c0_12] : memref<1x8x1xf32, #tpu.memory_space<vmem>>, vector<1x8x1xf32>
    %11 = vector.shape_cast %10 : vector<1x8x1xf32> to vector<8x1xf32>
    %cst = arith.constant dense<0.000000e+00> : vector<8x256xf32>
    %12 = tpu.matmul %5, %7, %cst {dimension_numbers = #tpu.dot_dimension_numbers<[1], [0], [0], [1], [0, 0, 1, 1], [], []>} : vector<8x128xf32>, vector<128x256xf32>, vector<8x256xf32> -> vector<8x256xf32>
    %13 = vector.extract_strided_slice %12 {offsets = [0, 0], sizes = [8, 128], strides = [1, 1]} : vector<8x256xf32> to vector<8x128xf32>
    %14 = vector.extract_strided_slice %12 {offsets = [0, 128], sizes = [8, 128], strides = [1, 1]} : vector<8x256xf32> to vector<8x128xf32>
    %15 = arith.negf %13 : vector<8x128xf32>
    %16 = math.exp %15 : vector<8x128xf32>
    %cst_13 = arith.constant 1.000000e+00 : f32
    %17 = vector.broadcast %cst_13 : f32 to vector<8x128xf32>
    %18 = arith.addf %17, %16 : vector<8x128xf32>
    %19 = arith.divf %17, %18 : vector<8x128xf32>
    %20 = arith.mulf %13, %19 : vector<8x128xf32>
    %21 = arith.mulf %20, %14 : vector<8x128xf32>
    %cst_14 = arith.constant dense<0.000000e+00> : vector<8x128xf32>
    %22 = tpu.matmul %21, %9, %cst_14 {dimension_numbers = #tpu.dot_dimension_numbers<[1], [0], [0], [1], [0, 0, 1, 1], [], []>} : vector<8x128xf32>, vector<128x128xf32>, vector<8x128xf32> -> vector<8x128xf32>
    %c0_15 = arith.constant 0 : index
    %c0_16 = arith.constant 0 : index
    %23 = vector.load %arg9[%c0_15, %c0_16] : memref<8x128xf32, #tpu.memory_space<vmem>>, vector<8x128xf32>
    %24 = vector.broadcast %11 : vector<8x1xf32> to vector<8x128xf32>
    %25 = arith.mulf %22, %24 : vector<8x128xf32>
    %26 = arith.addf %23, %25 : vector<8x128xf32>
    %c0_17 = arith.constant 0 : index
    %c0_18 = arith.constant 0 : index
    %27 = vector.load %arg9[%c0_17, %c0_18] : memref<8x128xf32, #tpu.memory_space<vmem>>, vector<8x128xf32>
    tpu.vector_store %arg9[%c0_17, %c0_18], %26 {strides = array<i32>} : memref<8x128xf32, #tpu.memory_space<vmem>>, vector<8x128xf32>,
    %c15_i32 = arith.constant 15 : i32
    %28 = arith.cmpi eq, %arg1, %c15_i32 : i32
    %c1_i32 = arith.constant 1 : i32
    %29 = arith.cmpi eq, %arg2, %c1_i32 : i32
    %30 = arith.andi %28, %29 : i1
    %31 = arith.extui %30 : i1 to i32
    %c0_i32_19 = arith.constant 0 : i32
    %32 = arith.cmpi ne, %31, %c0_i32_19 : i32
    scf.if %32 {
      %c0_20 = arith.constant 0 : index
      %c0_21 = arith.constant 0 : index
      %33 = vector.load %arg9[%c0_20, %c0_21] : memref<8x128xf32, #tpu.memory_space<vmem>>, vector<8x128xf32>
      %c0_22 = arith.constant 0 : index
      %c0_23 = arith.constant 0 : index
      %34 = vector.load %arg8[%c0_22, %c0_23] : memref<8x128xf32, #tpu.memory_space<vmem>>, vector<8x128xf32>
      tpu.vector_store %arg8[%c0_22, %c0_23], %33 {strides = array<i32>} : memref<8x128xf32, #tpu.memory_space<vmem>>, vector<8x128xf32>,
    } else {
    }
    return
  }
  func.func @transform_0(%arg0: i32, %arg1: i32, %arg2: i32, %arg3: memref<16xi32, #tpu.memory_space<smem>>) -> (i32, i32) {
    %c0_i32 = arith.constant 0 : i32
    %c0_i32_0 = arith.constant 0 : i32
    return %arg0, %c0_i32 : i32, i32
  }
  func.func @transform_1(%arg0: i32, %arg1: i32, %arg2: i32, %arg3: memref<16xi32, #tpu.memory_space<smem>>) -> (i32, i32, i32, i32) {
    %0 = arith.index_cast %arg1 : i32 to index
    %1 = memref.load %arg3[%0] : memref<16xi32, #tpu.memory_space<smem>>
    %c0_i32 = arith.constant 0 : i32
    %c0_i32_0 = arith.constant 0 : i32
    %c0_i32_1 = arith.constant 0 : i32
    return %1, %arg2, %c0_i32, %c0_i32_0 : i32, i32, i32, i32
  }
  func.func @transform_2(%arg0: i32, %arg1: i32, %arg2: i32, %arg3: memref<16xi32, #tpu.memory_space<smem>>) -> (i32, i32, i32) {
    %0 = arith.index_cast %arg1 : i32 to index
    %1 = memref.load %arg3[%0] : memref<16xi32, #tpu.memory_space<smem>>
    %c0_i32 = arith.constant 0 : i32
    %c0_i32_0 = arith.constant 0 : i32
    return %1, %arg2, %c0_i32 : i32, i32, i32
  }
  func.func @transform_3(%arg0: i32, %arg1: i32, %arg2: i32, %arg3: memref<16xi32, #tpu.memory_space<smem>>) -> (i32, i32, i32) {
    %c0_i32 = arith.constant 0 : i32
    %c0_i32_0 = arith.constant 0 : i32
    return %arg1, %arg0, %c0_i32 : i32, i32, i32
  }
  func.func @transform_4(%arg0: i32, %arg1: i32, %arg2: i32, %arg3: memref<16xi32, #tpu.memory_space<smem>>) -> (i32, i32) {
    %c0_i32 = arith.constant 0 : i32
    %c0_i32_0 = arith.constant 0 : i32
    return %arg0, %c0_i32 : i32, i32
  }
}

</mosaic_0001>

<bundles_post_ra>
// kernel: static_fused_moe.1
= control target key start
LH: loop header
LB: loop body
LE: loop exit
PB: predicated region body
PF: predicated region fallthrough
CT: control target
= control target key end

     0   :  { %s1081_s0 = inlined_call_operand.vmem [shape: s32[16], index: 0, kind: input, shape index: {}]   ;;  %s1082_s1 = inlined_call_operand.vmem [shape: f32[8,128], index: 1, kind: input, shape index: {}]   ;;  %s1083_s2 = inlined_call_operand.vmem [shape: f32[32,2,128,256], index: 2, kind: input, shape index: {}]   ;;  %s1084_s3 = inlined_call_operand.vmem [shape: f32[32,256,128], index: 3, kind: input, shape index: {}]   ;;  %s1085_s4 = inlined_call_operand.vmem [shape: f32[16,8,1], index: 4, kind: input, shape index: {}]   ;;  %s1086_s5 = inlined_call_operand.hbm [shape: f32[8,128], index: 5, kind: output, shape index: {}]  }
   0x1   :  { %s10_s20 = sshll.u32 %s1081_s0, 4  ;;  %s11_s20 = int_to_ptr.vmem [resolvable:$true] %s10_s20 }
   0x2   :  { %s795_s21 = scalar_lea.vmem %s11_s20, 16  ;;  %p800_p1 = scmp.lt.s32.totalorder %s11_s20, %s11_s20 }
   0x3   :  { %p796_p0 = scmp.ne.s32.totalorder %s11_s20, %s795_s21  ;;  %p801_p2 = scmp.lt.s32.totalorder %s795_s21, %s795_s21 }
   0x5   :  { %p802_p3 = por %p801_p2, %p800_p1 }
   0x7   :  { %p803_p4 = pnand %p802_p3, %p796_p0 }
   0x9   :  { %806 = shalt.err (!%p803_p4)  }
   0xa   :  { %s877_s22 = smov [#allocation4]  }
   0xb   :  { %13 = dma.vmem_to_smem %s11_s20, 16, %s877_s22, [#allocation3] }
   0xc   :  { %851 = dma.done.wait [#allocation3], 16 }
   0xd   :  { %852 = vsyncadd [#allocation3], 4294967280 }
   0xe   :  { %15 = sfence }
   0xf   :  { %16 = vsyncpa [#allocation6], 0  ;;  %s916_s23 = smov 0   ;;  %s918_s24 = smov 0  }
  0x10   :  { %s920_s25 = smov 0   ;;  %s922_s0 = smov 0  }
  0x11   :  { %s924_s26 = smov 0  }
  0x12 LB: > { %s34_s28 = sadd.s32 1, %s867_s25  ;;  %s37_s29 = sadd.s32 1, %s871_s0  ;;  %s875_s26 = sphi %s924_s26, %s22_s26   ;;  %s871_s0 = sphi %s922_s0, %s1092_s0   ;;  %s867_s25 = sphi %s920_s25, %s1091_s25   ;;  %s863_s24 = sphi %s918_s24, %s1090_s24   ;;  %s859_s23 = sphi %s916_s23, %s1089_s23  }
  0x13   : > { %p35_p5 = scmp.ge.s32.totalorder %s34_s28, 2  ;;  %p673_p6 = scmp.ge.s32.totalorder %s875_s26, 1 }
  0x14   : > { %p243_p7 = scmp.lt.s32.totalorder %s875_s26, 33 }
  0x15   : > { %s1094_s28 = smov (%p35_p5, %s34_s28), 0  ;;  %s1096_s29 = smov (!%p35_p5, %s37_s29), %s871_s0 }
  0x16   : > { %p244_p8 = pnand %p673_p6, %p243_p7  ;;  %p39_p9 = scmp.ge.s32.totalorder %s1096_s29, 16 }
  0x17   : > { %s294_s30 = sld [smem:[#allocation4 + %s863_s24]] (!%p244_p8)  ;;  %p297_p10 = scmp.lt.s32.totalorder (!%p244_p8), %s859_s23, 1 }
  0x18   : > { %s1098_s29 = smov (%p39_p9, %s1096_s29), 0  ;;  %247 = sbr.rel (%p244_p8) target bundleno = 527 (0x20f), region = 36 }
  0x19   : > { %s305_s6 = sld [smem:[#allocation4 + %s863_s24]] (!%p244_p8)  ;;  %s677_s7 = sshll.u32 (!%p244_p8), %s859_s23, 4 }
  0x1a   : > { %p309_p11 = scmp.lt.s32.totalorder (!%p244_p8), %s677_s7, 31  ;;  %p317_p12 = scmp.lt.s32.totalorder (!%p244_p8), %s863_s24, 15 }
  0x1b   : > { %p324_p13 = scmp.eq.s32.totalorder (!%p244_p8), %s863_s24, 0  ;;  %p325_p1 = scmp.eq.s32.totalorder (!%p244_p8), %s859_s23, 0 }
  0x1d   : > { %s298_s8 = scalar_select %p297_p10, %s859_s23, 1 }
  0x1e   : > { %s1100_s7 = smov (!%p309_p11, %s677_s7), 31  ;;  %p295_p0 = scmp.lt.s32.totalorder %s294_s30, 31 }
  0x1f   : > { %s674_s9 = sshll.u32 %s298_s8, 5  ;;  %p307_p2 = scmp.lt.s32.totalorder %s305_s6, 31 }
  0x20   : > { %s1102_s30 = smov (!%p295_p0, %s294_s30), 31  ;;  %p326_p3 = pnand %p325_p1, %p324_p13 }
  0x21   : > { %s1104_s6 = smov (!%p307_p2, %s305_s6), 31  ;;  %s675_s10 = sshll.u32 %s1102_s30, 6 }
  0x22   : > { %s301_s11 = sadd.s32 %s675_s10, %s674_s9  ;;  %s678_s12 = sshll.u32 %s1104_s6, 5 }
  0x23   : > { %s676_s13 = sshll.u32 %s301_s11, 3  ;;  %s312_s14 = sadd.s32 %s678_s12, %s1100_s7 }
  0x24   : > { %s962_s17 = scalar_lea.vmem %s1083_s2, %s676_s13  ;;  %s679_s18 = sshll.u32 %s312_s14, 3 }
  0x25   : > { %s967_s21 = scalar_lea.vmem %s1084_s3, %s679_s18  ;;  %329 = sbr.rel (%p326_p3) target bundleno = 44 (0x2c), region = 40 }
  0x26   : > { %s318_s22 = scalar_select %p317_p12, %s863_s24, 15 }
  0x28   : > { %s680_s8 = sshll.u32 %s318_s22, 3 }
  0x29   : > { %s975_s6 = scalar_lea.vmem %s1085_s4, %s680_s8 }
  0x2a   : > { %v878_v0 = vmov 0.0  }
  0x2b   : > { %330 = vst [vmem:[#allocation2] sm:$0xff] %v878_v0 }
  0x2c PF: > { %v363_v1 = vld [vmem:[%s962_s17 + $0xf8] sm:$0xff]  ;;  %v362_v2 = vld [vmem:[%s962_s17 + $0xf0] sm:$0xff]  ;;  %v361_v3 = vld [vmem:[%s962_s17 + $0xe8] sm:$0xff]  ;;  %v879_v5 = vmov 0.0   ;;  %vm880_vm0 = vmmov 0   ;;  %v881_v52 = vmov 0  }
  0x2d   : > { %381 = vmatprep.subr.mxu0 %v363_v1  ;;  %v360_v4 = vld [vmem:[%s962_s17 + $0xe0] sm:$0xff]  ;;  %445 = vmatprep.mubr.f32.mxu0 %v879_v5  ;;  %v359_v6 = vld [vmem:[%s962_s17 + $0xd8] sm:$0xff]  ;;  %v358_v7 = vld [vmem:[%s962_s17 + $0xd0] sm:$0xff]  ;;  %p539_p4 = scmp.eq.s32.totalorder %s863_s24, 15  ;;  %p540_p5 = scmp.eq.s32.totalorder %s859_s23, 1 }
  0x2e   : > { %382 = vmatpush1.msra.mxu0 %v362_v2  ;;  %703 = vmatprep.subr.mxu1 %v879_v5  ;;  %v357_v8 = vld [vmem:[%s962_s17 + $0xc8] sm:$0xff]  ;;  %v356_v9 = vld [vmem:[%s962_s17 + $0xc0] sm:$0xff]  ;;  %v355_v10 = vld [vmem:[%s962_s17 + $0xb8] sm:$0xff] }
  0x2f   : > { %383 = vmatprep.subr.mxu0 %v361_v3  ;;  %v354_v11 = vld [vmem:[%s962_s17 + $0xb0] sm:$0xff]  ;;  %v353_v12 = vld [vmem:[%s962_s17 + $0xa8] sm:$0xff]  ;;  %v352_v13 = vld [vmem:[%s962_s17 + $0xa0] sm:$0xff]  ;;  %735 = vmatprep.mubr.msk.f32.mxu1 %vm880_vm0, %v879_v5  ;;  %p541_p6 = pnand %p540_p5, %p539_p4 }
  0x30   : > { %384 = vmatpush1.msra.mxu0 %v360_v4  ;;  %v351_v14 = vld [vmem:[%s962_s17 + $0x98] sm:$0xff]  ;;  %v350_v15 = vld [vmem:[%s962_s17 + $0x90] sm:$0xff]  ;;  %v349_v16 = vld [vmem:[%s962_s17 + $0x88] sm:$0xff]  ;;  %790 = vset.pattern.permute.xlu0 %v881_v52 }
  0x31   : > { %385 = vmatprep.subr.mxu0 %v359_v6  ;;  %v348_v17 = vld [vmem:[%s962_s17 + $0x80] sm:$0xff]  ;;  %v347_v18 = vld [vmem:[%s962_s17 + $0x78] sm:$0xff]  ;;  %v346_v19 = vld [vmem:[%s962_s17 + $0x70] sm:$0xff] }
  0x32   : > { %386 = vmatpush1.msra.mxu0 %v358_v7  ;;  %v345_v20 = vld [vmem:[%s962_s17 + $0x68] sm:$0xff]  ;;  %v344_v21 = vld [vmem:[%s962_s17 + $0x60] sm:$0xff]  ;;  %v343_v22 = vld [vmem:[%s962_s17 + $0x58] sm:$0xff] }
  0x33   : > { %387 = vmatprep.subr.mxu0 %v357_v8  ;;  %v342_v23 = vld [vmem:[%s962_s17 + $0x50] sm:$0xff]  ;;  %v341_v24 = vld [vmem:[%s962_s17 + $0x48] sm:$0xff]  ;;  %v340_v25 = vld [vmem:[%s962_s17 + $0x40] sm:$0xff] }
  0x34   : > { %388 = vmatpush1.msra.mxu0 %v356_v9  ;;  %v339_v26 = vld [vmem:[%s962_s17 + $0x38] sm:$0xff]  ;;  %v338_v27 = vld [vmem:[%s962_s17 + $0x30] sm:$0xff]  ;;  %v337_v28 = vld [vmem:[%s962_s17 + $0x28] sm:$0xff] }
  0x35   : > { %389 = vmatprep.subr.mxu0 %v355_v10  ;;  %v336_v29 = vld [vmem:[%s962_s17 + $0x20] sm:$0xff]  ;;  %v335_v30 = vld [vmem:[%s962_s17 + $0x18] sm:$0xff]  ;;  %v334_v31 = vld [vmem:[%s962_s17 + $0x10] sm:$0xff] }
  0x36   : > { %390 = vmatpush1.msra.mxu0 %v354_v11  ;;  %v333_v32 = vld [vmem:[%s962_s17 + $0x8] sm:$0xff]  ;;  %v332_v33 = vld [vmem:[%s962_s17] sm:$0xff]  ;;  %v379_v35 = vld [vmem:[%s967_s21 + $0x78] sm:$0xff] }
  0x37   : > { %391 = vmatprep.subr.mxu0 %v353_v12  ;;  %v331_v34 = vld [vmem:[%s1082_s1] sm:$0xff]  ;;  %704 = vmatpush3.msra.mxu1 %v379_v35  ;;  %v378_v36 = vld [vmem:[%s967_s21 + $0x70] sm:$0xff]  ;;  %v377_v37 = vld [vmem:[%s967_s21 + $0x68] sm:$0xff] }
  0x38   : > { %392 = vmatpush1.msra.mxu0 %v352_v13  ;;  %705 = vmatprep.subr.mxu1 %v879_v5  ;;  %v376_v38 = vld [vmem:[%s967_s21 + $0x60] sm:$0xff]  ;;  %v375_v39 = vld [vmem:[%s967_s21 + $0x58] sm:$0xff]  ;;  %v374_v40 = vld [vmem:[%s967_s21 + $0x50] sm:$0xff] }
  0x39   : > { %393 = vmatprep.subr.mxu0 %v351_v14  ;;  %706 = vmatpush3.msra.mxu1 %v378_v36  ;;  %v373_v41 = vld [vmem:[%s967_s21 + $0x48] sm:$0xff]  ;;  %v372_v42 = vld [vmem:[%s967_s21 + $0x40] sm:$0xff]  ;;  %v371_v43 = vld [vmem:[%s967_s21 + $0x38] sm:$0xff] }
  0x3a   : > { %394 = vmatpush1.msra.mxu0 %v350_v15  ;;  %707 = vmatprep.subr.mxu1 %v879_v5  ;;  %v370_v44 = vld [vmem:[%s967_s21 + $0x30] sm:$0xff]  ;;  %v369_v45 = vld [vmem:[%s967_s21 + $0x28] sm:$0xff]  ;;  %v368_v46 = vld [vmem:[%s967_s21 + $0x20] sm:$0xff] }
  0x3b   : > { %395 = vmatprep.subr.mxu0 %v349_v16  ;;  %708 = vmatpush3.msra.mxu1 %v377_v37  ;;  %v367_v47 = vld [vmem:[%s967_s21 + $0x18] sm:$0xff]  ;;  %v366_v48 = vld [vmem:[%s967_s21 + $0x10] sm:$0xff]  ;;  %v365_v49 = vld [vmem:[%s967_s21 + $0x8] sm:$0xff] }
  0x3c   : > { %396 = vmatpush1.msra.mxu0 %v348_v17  ;;  %709 = vmatprep.subr.mxu1 %v879_v5  ;;  %v364_v50 = vld [vmem:[%s967_s21] sm:$0xff] }
  0x3d   : > { %397 = vmatprep.subr.mxu0 %v347_v18  ;;  %710 = vmatpush3.msra.mxu1 %v376_v38  ;;  %v380_v51 = vld [vmem:[%s975_s6] sm:$0xff] }
  0x3e   : > { %398 = vmatpush1.msra.mxu0 %v346_v19  ;;  %711 = vmatprep.subr.mxu1 %v879_v5  ;;  %v530_v63 = vld [vmem:[#allocation2] sm:$0xff] }
  0x3f   : > { %399 = vmatprep.subr.mxu0 %v345_v20  ;;  %712 = vmatpush3.msra.mxu1 %v375_v39 }
  0x40   : > { %400 = vmatpush1.msra.mxu0 %v344_v21  ;;  %713 = vmatprep.subr.mxu1 %v879_v5 }
  0x41   : > { %401 = vmatprep.subr.mxu0 %v343_v22  ;;  %714 = vmatpush3.msra.mxu1 %v374_v40 }
  0x42   : > { %402 = vmatpush1.msra.mxu0 %v342_v23  ;;  %715 = vmatprep.subr.mxu1 %v879_v5 }
  0x43   : > { %403 = vmatprep.subr.mxu0 %v341_v24  ;;  %716 = vmatpush3.msra.mxu1 %v373_v41 }
  0x44   : > { %404 = vmatpush1.msra.mxu0 %v340_v25  ;;  %717 = vmatprep.subr.mxu1 %v879_v5 }
  0x45   : > { %405 = vmatprep.subr.mxu0 %v339_v26  ;;  %718 = vmatpush3.msra.mxu1 %v372_v42 }
  0x46   : > { %406 = vmatpush1.msra.mxu0 %v338_v27  ;;  %719 = vmatprep.subr.mxu1 %v879_v5 }
  0x47   : > { %407 = vmatprep.subr.mxu0 %v337_v28  ;;  %720 = vmatpush3.msra.mxu1 %v371_v43 }
  0x48   : > { %408 = vmatpush1.msra.mxu0 %v336_v29  ;;  %721 = vmatprep.subr.mxu1 %v879_v5 }
  0x49   : > { %409 = vmatprep.subr.mxu0 %v335_v30  ;;  %722 = vmatpush3.msra.mxu1 %v370_v44 }
  0x4a   : > { %410 = vmatpush1.msra.mxu0 %v334_v31  ;;  %723 = vmatprep.subr.mxu1 %v879_v5 }
  0x4b   : > { %411 = vmatprep.subr.mxu0 %v333_v32  ;;  %724 = vmatpush3.msra.mxu1 %v369_v45 }
  0x4c   : > { %412 = vmatpush1.msra.mxu0 %v332_v33  ;;  %725 = vmatprep.subr.mxu1 %v879_v5 }
  0x4d   : > { %446 = vmatmul.mubr.f32.vlgmr.msra.gmra.mxu0 %v331_v34  ;;  %726 = vmatpush3.msra.mxu1 %v368_v46 }
  0x4e   : > { %727 = vmatprep.subr.mxu1 %v879_v5  ;;  %533 = vperm.xlu0 %790, %v380_v51  }
  0x4f   : > { %728 = vmatpush3.msra.mxu1 %v367_v47 }
  0x50   : > { %729 = vmatprep.subr.mxu1 %v879_v5 }
  0x51   : > { %730 = vmatpush3.msra.mxu1 %v366_v48 }
  0x52   : > { %731 = vmatprep.subr.mxu1 %v879_v5 }
  0x53   : > { %732 = vmatpush3.msra.mxu1 %v365_v49 }
  0x54   : > { %733 = vmatprep.subr.mxu1 %v879_v5 }
  0x55   : > { %734 = vmatpush3.msra.mxu1 %v364_v50 }
  0xc9   : > { %v534_v61 = vpop.permute.xlu0 %533 }
 0x10d   : > { %v447_v53 = vpop.f32.mrf.mxu0 }
 0x10e   : > { %v681_v54 = vmul.f32 -1.442695, %v447_v53 }
 0x10f   : > { %v449_v59 = vpop.f32.mrf.mxu0 }
 0x110   : > { %791 = vpow2.f32 %v681_v54 }
 0x11d   : > { %v792_v55 = vpop.eup %791 }
 0x11e   : > { %v455_v56 = vadd.f32 1.0, %v792_v55 }
 0x120   : > { %793 = vrcp.f32 %v455_v56 }
 0x12d   : > { %v794_v57 = vpop.eup %793 }
 0x12e   : > { %v458_v58 = vmul.f32 %v794_v57, %v447_v53 }
 0x130   : > { %v459_v60 = vmul.f32 %v458_v58, %v449_v59 }
 0x132   : > { %736 = vmatmul.mubr.f32.vlgmr.msra.gmra.mxu1 %v459_v60 }
 0x1f2   : > { %v526_v62 = vpop.f32.mrf.mxu1 }
 0x1f3   : > { %v536_v0 = vmul.f32 %v534_v61, %v526_v62  ;;  %544 = sbr.rel (%p541_p6) target bundleno = 512 (0x200), region = 44 }
 0x1f4   : > { %v737_v1 = vpop.f32.mrf.mxu1 }
 0x1f5   : > { %v537_v2 = vadd.f32 %v536_v0, %v530_v63 }
 0x1f7   : > { %538 = vst [vmem:[#allocation2] sm:$0xff] %v537_v2 }
 0x1fe   : > { %v545_v3 = vld [vmem:[#allocation2] sm:$0xff] }
 0x1ff   : > { %546 = vst [vmem:[#allocation5] sm:$0xff] %v545_v3 }
 0x200 PF: > { %s1087_s9 = sadd.s32 4294967295, %s875_s26   ;;  %s882_s23 = smov [#allocation5]  }
 0x201   : > { %p1051_p7 = scmp.eq.s32.totalorder %s1087_s9, 31  ;;  %s556_s24 = sshll.u32 %s882_s23, 4  ;;  %s557_s24 = int_to_ptr.vmem [resolvable:$true] %s556_s24 }
 0x202   : > { %s807_s11 = scalar_lea.vmem %s557_s24, 128  ;;  %p814_p11 = scmp.lt.s32.totalorder %s557_s24, %s557_s24 }
 0x203   : > { %p808_p8 = scmp.ne.s32.totalorder %s557_s24, %s807_s11  ;;  %p815_p12 = scmp.lt.s32.totalorder %s807_s11, %s807_s11 }
 0x205   : > { %p809_p9 = pnand %p808_p8, %p1051_p7  ;;  %p816_p13 = por %p815_p12, %p814_p11 }
 0x207   : > { %p810_p10 = pneg %p809_p9 }
 0x209   : > { %p817_p0 = pnand %p816_p13, %p810_p10 }
 0x20b   : > { %820 = shalt.err (!%p817_p0)
}
 0x20c   : > { %739 = dma.vmem_to_hbm [thread:$0]  (%p1051_p7), %s557_s24, 128, %s1086_s5, [#allocation6]  }
 0x20d   : > { %854 = dma.done.wait (%p1051_p7), [#allocation6], 128  }
 0x20e   : > { %856 = vsyncadd (%p1051_p7), [#allocation6], 4294967168 }
 0x20f PF: > { %s22_s26 = sadd.s32 1, %s875_s26   ;;  %s1089_s23 = smov %s867_s25 }
 0x210   : > { %p19_p1 = scmp.ge.s32.totalorder %s22_s26, 34   ;;  %s1090_s24 = smov %s871_s0 }
 0x211   : > { %s1091_s25 = smov %s1094_s28  ;;  %s1092_s0 = smov %s1098_s29 }
 0x212   :  { %21 = sbr.rel (!%p19_p1) target bundleno = 18 (0x12), region = 81 }
 0x217   :  { %569 = vsyncpa [#allocation6], 1 }
 0x218   :  { %571 = vsyncpa [#allocation6 + $0x1], 1 }

</bundles_post_ra>
